<compile_context>
chip_gen: v6e
topology: v6e:2x2x1
jax: 0.10.0
libtpu: 0.0.40
codegen_flags: <defaults>
</compile_context>

<pallas_src>
import functools
import math

import jax
import jax.numpy as jnp
from jax.experimental import pallas as pl
from jax.experimental.pallas import tpu as pltpu

BN_EPS = 1e-5
ACT_DTYPE = jnp.bfloat16  # inter-layer activation dtype


# ---------------------------------------------------------------------------
# Helpers
# ---------------------------------------------------------------------------
def _round_up(x, m):
    return (x + m - 1) // m * m


def _pick_tile(dim, candidates):
    """Largest candidate that evenly divides `dim`, else the full dim."""
    for t in candidates:
        if dim % t == 0:
            return t
    return dim


# ---------------------------------------------------------------------------
# Pallas kernels
# ---------------------------------------------------------------------------
def _gemm_bn_kernel(x_ref, w_ref, scale_ref, bias_ref, o_ref, acc_ref, *, relu):
    """acc += x @ w over K grid; epilogue: y = acc*scale + bias (+ReLU)."""
    k = pl.program_id(2)

    @pl.when(k == 0)
    def _():
        acc_ref[...] = jnp.zeros_like(acc_ref)

    acc_ref[...] += jnp.dot(x_ref[...], w_ref[...],
                            preferred_element_type=jnp.float32)

    @pl.when(k == pl.num_programs(2) - 1)
    def _():
        y = acc_ref[...] * scale_ref[...] + bias_ref[...]
        if relu:
            y = jnp.maximum(y, 0.0)
        o_ref[...] = y.astype(o_ref.dtype)


def _gemm_bn_res_kernel(x_ref, w_ref, scale_ref, bias_ref, res_ref, o_ref,
                        acc_ref, *, relu):
    """Same as _gemm_bn_kernel, plus a fused residual add in the epilogue."""
    k = pl.program_id(2)

    @pl.when(k == 0)
    def _():
        acc_ref[...] = jnp.zeros_like(acc_ref)

    acc_ref[...] += jnp.dot(x_ref[...], w_ref[...],
                            preferred_element_type=jnp.float32)

    @pl.when(k == pl.num_programs(2) - 1)
    def _():
        y = (acc_ref[...] * scale_ref[...] + bias_ref[...]
             + res_ref[...].astype(jnp.float32))
        if relu:
            y = jnp.maximum(y, 0.0)
        o_ref[...] = y.astype(o_ref.dtype)


def _maxpool_kernel(p_ref, o_ref):
    # p_ref: (9, tm, C) shifted window slices; reduce max over the window axis.
    o_ref[...] = jnp.max(p_ref[...], axis=0)


# ---------------------------------------------------------------------------
# Wrappers around pallas_call
# ---------------------------------------------------------------------------
def gemm_bn(x, w, scale, bias, residual, relu):
    """(M,K) @ (K,N) * scale + bias (+ residual) (+ relu) -> bf16, via Pallas."""
    M, K = x.shape
    _, N = w.shape

    # M only needs sublane (8) alignment; channel dims (K, N) are handled by
    # full-dim blocks so they never need padding.
    Mp = _round_up(M, 8)
    if Mp != M:
        x = jnp.pad(x, ((0, Mp - M), (0, 0)))
        if residual is not None:
            residual = jnp.pad(residual, ((0, Mp - M), (0, 0)))

    tm = _pick_tile(Mp, (256, 128, 64, 32, 16, 8))
    tn = _pick_tile(N, (256, 128))
    # Tile the K reduction only when both K and M are large enough to amortise
    # the ~0.35us per-grid-step overhead; otherwise use one full-K block.
    if K % 128 == 0 and K >= 2048 and Mp >= 256:
        tk = _pick_tile(K, (512, 256, 128))
    else:
        tk = K
    nm, nn, nk = Mp // tm, N // tn, K // tk

    xp = x.astype(jnp.bfloat16)
    wp = w.astype(jnp.bfloat16)
    sp = scale.astype(jnp.float32).reshape(1, N)
    bp = bias.astype(jnp.float32).reshape(1, N)

    in_specs = [
        pl.BlockSpec((tm, tk), lambda i, j, k: (i, k)),
        pl.BlockSpec((tk, tn), lambda i, j, k: (k, j)),
        pl.BlockSpec((1, tn), lambda i, j, k: (0, j)),
        pl.BlockSpec((1, tn), lambda i, j, k: (0, j)),
    ]
    args = [xp, wp, sp, bp]
    if residual is None:
        kernel = functools.partial(_gemm_bn_kernel, relu=relu)
    else:
        kernel = functools.partial(_gemm_bn_res_kernel, relu=relu)
        in_specs.append(pl.BlockSpec((tm, tn), lambda i, j, k: (i, j)))
        args.append(residual.astype(ACT_DTYPE))

    # Rough VMEM budget: double-buffered bf16 input/output tiles + f32 acc.
    est = 2 * (tm * tk + tk * tn) * 2 + 2 * tm * tn * 2 + tm * tn * 4
    if residual is not None:
        est += 2 * tm * tn * 2
    est += 4 * tn * 4  # scale + bias
    vmem_limit = int(min(2 * est, 60 * 1024 * 1024))
    if vmem_limit <= 16 * 1024 * 1024:
        vmem_limit = None  # fits the most conservative default (v5e)

    out = pl.pallas_call(
        kernel,
        out_shape=jax.ShapeDtypeStruct((Mp, N), ACT_DTYPE),
        grid_spec=pltpu.PrefetchScalarGridSpec(
            num_scalar_prefetch=0,
            grid=(nm, nn, nk),
            in_specs=in_specs,
            out_specs=pl.BlockSpec((tm, tn), lambda i, j, k: (i, j)),
            scratch_shapes=[pltpu.VMEM((tm, tn), jnp.float32)],
        ),
        compiler_params=pltpu.CompilerParams(
            dimension_semantics=("parallel", "parallel", "arbitrary"),
            vmem_limit_bytes=vmem_limit),
    )(*args)
    return out if Mp == M else out[:M]


def _im2col(x, kh, kw, stride, pad, pad_value=0.0):
    """x: (N,H,W,C) -> (patches (N,OH,OW,kh*kw*C), OH, OW)."""
    N, H, W, C = x.shape
    OH = (H + 2 * pad - kh) // stride + 1
    OW = (W + 2 * pad - kw) // stride + 1
    xp = jnp.pad(x, ((0, 0), (pad, pad), (pad, pad), (0, 0)),
                 constant_values=pad_value)
    cols = []
    for i in range(kh):
        for j in range(kw):
            cols.append(xp[:, i:i + (OH - 1) * stride + 1:stride,
                           j:j + (OW - 1) * stride + 1:stride, :])
    return jnp.concatenate(cols, axis=-1), OH, OW


def conv_bn(x, w, gamma, beta, stride, relu, residual=None):
    """Fused Conv2d(bias=False, pad=(k-1)//2) + BatchNorm (+res) (+ReLU)."""
    KH, KW, Cin, Cout = w.shape
    pad = (KH - 1) // 2
    N = x.shape[0]
    patches, OH, OW = _im2col(x, KH, KW, stride, pad)
    M = N * OH * OW
    p2 = patches.reshape(M, KH * KW * Cin)
    w2 = w.reshape(KH * KW * Cin, Cout)
    # Eval-mode BN with running_mean=0, running_var=1 (default init):
    scale = gamma / jnp.sqrt(jnp.float32(1.0) + BN_EPS)
    bias = beta
    res2 = None if residual is None else residual.reshape(M, Cout)
    out = gemm_bn(p2, w2, scale, bias, res2, relu)
    return out.reshape(N, OH, OW, Cout)


def maxpool_3x3_s2(x):
    """MaxPool2d(kernel_size=3, stride=2, padding=1) on NHWC input."""
    N, H, W, C = x.shape
    k, s, pad = 3, 2, 1
    OH = (H + 2 * pad - k) // s + 1
    OW = (W + 2 * pad - k) // s + 1
    neg = float(jnp.finfo(x.dtype).min)
    xp = jnp.pad(x, ((0, 0), (pad, pad), (pad, pad), (0, 0)),
                 constant_values=neg)
    wins = []
    for i in range(k):
        for j in range(k):
            wins.append(xp[:, i:i + (OH - 1) * s + 1:s,
                           j:j + (OW - 1) * s + 1:s, :])
    M = N * OH * OW
    p = jnp.stack(wins, axis=0).reshape(k * k, M, C)
    Mp = _round_up(M, 8)
    if Mp != M:
        p = jnp.pad(p, ((0, 0), (0, Mp - M), (0, 0)), constant_values=neg)
    tm = _pick_tile(Mp, (512, 256, 128, 64, 32, 16, 8))

    out = pl.pallas_call(
        _maxpool_kernel,
        out_shape=jax.ShapeDtypeStruct((Mp, C), x.dtype),
        grid_spec=pltpu.PrefetchScalarGridSpec(
            num_scalar_prefetch=0,
            grid=(Mp // tm,),
            in_specs=[pl.BlockSpec((k * k, tm, C), lambda i: (0, i, 0))],
            out_specs=pl.BlockSpec((tm, C), lambda i: (i, 0)),
        ),
        compiler_params=pltpu.CompilerParams(
            dimension_semantics=("parallel",)),
    )(p)
    out = out if Mp == M else out[:M]
    return out.reshape(N, OH, OW, C)


# ---------------------------------------------------------------------------
# Parameter construction (deterministic, matches ResNet-34 __init__ shapes)
# ---------------------------------------------------------------------------
def _conv_init(key, kh, kw, cin, cout):
    n = kh * kw * cout
    std = math.sqrt(2.0 / n)
    return jax.random.normal(key, (kh, kw, cin, cout), jnp.float32) * std


def make_params(key, width=1):
    base = int(64 * width)
    keys = iter(jax.random.split(key, 256))
    params = {
        'stem_w': _conv_init(next(keys), 7, 7, 3, 64),
        'stem_gamma': jnp.ones((64,), jnp.float32),
        'stem_beta': jnp.zeros((64,), jnp.float32),
        'layers': [],
    }
    layer_cfg = [(base, 3, 1), (base * 2, 4, 2), (base * 4, 6, 2),
                 (base * 8, 3, 2)]
    inplanes = 64
    for planes, nblocks, stride in layer_cfg:
        blocks = []
        for b in range(nblocks):
            st = stride if b == 0 else 1
            blk = {
                'stride': st,
                'w1': _conv_init(next(keys), 3, 3, inplanes, planes),
                'g1': jnp.ones((planes,), jnp.float32),
                'b1': jnp.zeros((planes,), jnp.float32),
                'w2': _conv_init(next(keys), 3, 3, planes, planes),
                'g2': jnp.ones((planes,), jnp.float32),
                'b2': jnp.zeros((planes,), jnp.float32),
            }
            if b == 0 and (st != 1 or inplanes != planes):
                blk['wd'] = _conv_init(next(keys), 1, 1, inplanes, planes)
                blk['gd'] = jnp.ones((planes,), jnp.float32)
                blk['bd'] = jnp.zeros((planes,), jnp.float32)
            blocks.append(blk)
            inplanes = planes
        params['layers'].append(blocks)
    return params


# ---------------------------------------------------------------------------
# Forward pass (InsResNet34: returns (x4, x5, x6, x7, x8))
# ---------------------------------------------------------------------------
def basic_block(x, blk):
    out = conv_bn(x, blk['w1'], blk['g1'], blk['b1'], blk['stride'], relu=True)
    if 'wd' in blk:
        residual = conv_bn(x, blk['wd'], blk['gd'], blk['bd'], blk['stride'],
                           relu=False)
    else:
        residual = x
    out = conv_bn(out, blk['w2'], blk['g2'], blk['b2'], 1, relu=True,
                  residual=residual)
    return out


def ins_resnet34_forward(x_nchw, params):
    """x_nchw: (N, 3, H, W) -> tuple of 5 NCHW feature maps (x4..x8)."""
    x = jnp.transpose(x_nchw, (0, 2, 3, 1)).astype(ACT_DTYPE)  # NCHW -> NHWC
    x = conv_bn(x, params['stem_w'], params['stem_gamma'],
                params['stem_beta'], stride=2, relu=True)       # conv1+bn1+relu
    x4 = maxpool_3x3_s2(x)
    feats = [x4]
    h = x4
    for blocks in params['layers']:
        for blk in blocks:
            h = basic_block(h, blk)
        feats.append(h)
    # NHWC -> NCHW, return f32 like the PyTorch reference.
    return tuple(jnp.transpose(f, (0, 3, 1, 2)).astype(jnp.float32)
                 for f in feats)


if __name__ == "__main__":
    key = jax.random.PRNGKey(0)
    pkey, xkey = jax.random.split(key)
    params = make_params(pkey, width=1)
    x = jax.random.normal(xkey, (2, 3, 32, 32), jnp.float32)

    outs = ins_resnet34_forward(x, params)
    outs = jax.block_until_ready(outs)

    expected = [(2, 64, 8, 8), (2, 64, 8, 8), (2, 128, 4, 4),
                (2, 256, 2, 2), (2, 512, 1, 1)]
    got = [tuple(o.shape) for o in outs]
    assert got == expected, got
    assert all(bool(jnp.all(jnp.isfinite(o))) for o in outs)
    print("KERNEL_OK")
</pallas_src>

<mosaic_0001>
module attributes {stable_mosaic.version = 11 : i64} {
  func.func @_gemm_bn_kernel(%arg0: i32, %arg1: i32, %arg2: i32, %arg3: memref<256x147xbf16, #tpu.memory_space<vmem>>, %arg4: memref<147x64xbf16, #tpu.memory_space<vmem>>, %arg5: memref<1x64xf32, #tpu.memory_space<vmem>>, %arg6: memref<1x64xf32, #tpu.memory_space<vmem>>, %arg7: memref<256x64xbf16, #tpu.memory_space<vmem>>, %arg8: memref<256x64xf32, #tpu.memory_space<vmem>>) attributes {dimension_semantics = [#tpu.dimension_semantics<parallel>, #tpu.dimension_semantics<parallel>, #tpu.dimension_semantics<arbitrary>], iteration_bounds = array<i64: 2, 1, 1>, scalar_prefetch = 0 : i64, scratch_operands = 1 : i64, tpu.core_type = #tpu.core_type<tc>, window_params = [{transform_indices = @transform_0, window_bounds = array<i64: 256, 147>}, {transform_indices = @transform_1, window_bounds = array<i64: 147, 64>}, {transform_indices = @transform_2, window_bounds = array<i64: 1, 64>}, {transform_indices = @transform_3, window_bounds = array<i64: 1, 64>}, {transform_indices = @transform_4, window_bounds = array<i64: 256, 64>}]} {
    %c0_i32 = arith.constant 0 : i32
    %0 = arith.cmpi eq, %arg2, %c0_i32 : i32
    %1 = arith.extui %0 : i1 to i32
    %c0_i32_0 = arith.constant 0 : i32
    %2 = arith.cmpi ne, %1, %c0_i32_0 : i32
    scf.if %2 {
      %cst_10 = arith.constant 0.000000e+00 : f32
      %12 = vector.broadcast %cst_10 : f32 to vector<256x64xf32>
      %c0_11 = arith.constant 0 : index
      %c0_12 = arith.constant 0 : index
      %13 = vector.load %arg8[%c0_11, %c0_12] : memref<256x64xf32, #tpu.memory_space<vmem>>, vector<256x64xf32>
      tpu.vector_store %arg8[%c0_11, %c0_12], %12 {strides = array<i32>} : memref<256x64xf32, #tpu.memory_space<vmem>>, vector<256x64xf32>,
    } else {
    }
    %c0 = arith.constant 0 : index
    %c0_1 = arith.constant 0 : index
    %3 = vector.load %arg8[%c0, %c0_1] : memref<256x64xf32, #tpu.memory_space<vmem>>, vector<256x64xf32>
    %c0_2 = arith.constant 0 : index
    %c0_3 = arith.constant 0 : index
    %4 = vector.load %arg3[%c0_2, %c0_3] : memref<256x147xbf16, #tpu.memory_space<vmem>>, vector<256x147xbf16>
    %c0_4 = arith.constant 0 : index
    %c0_5 = arith.constant 0 : index
    %5 = vector.load %arg4[%c0_4, %c0_5] : memref<147x64xbf16, #tpu.memory_space<vmem>>, vector<147x64xbf16>
    %cst = arith.constant dense<0.000000e+00> : vector<256x64xf32>
    %6 = tpu.matmul %4, %5, %cst {dimension_numbers = #tpu.dot_dimension_numbers<[1], [0], [0], [1], [0, 0, 1, 1], [], []>} : vector<256x147xbf16>, vector<147x64xbf16>, vector<256x64xf32> -> vector<256x64xf32>
    %7 = arith.addf %3, %6 : vector<256x64xf32>
    %c0_6 = arith.constant 0 : index
    %c0_7 = arith.constant 0 : index
    %8 = vector.load %arg8[%c0_6, %c0_7] : memref<256x64xf32, #tpu.memory_space<vmem>>, vector<256x64xf32>
    tpu.vector_store %arg8[%c0_6, %c0_7], %7 {strides = array<i32>} : memref<256x64xf32, #tpu.memory_space<vmem>>, vector<256x64xf32>,
    %c0_i32_8 = arith.constant 0 : i32
    %9 = arith.cmpi eq, %arg2, %c0_i32_8 : i32
    %10 = arith.extui %9 : i1 to i32
    %c0_i32_9 = arith.constant 0 : i32
    %11 = arith.cmpi ne, %10, %c0_i32_9 : i32
    scf.if %11 {
      %c0_10 = arith.constant 0 : index
      %c0_11 = arith.constant 0 : index
      %12 = vector.load %arg8[%c0_10, %c0_11] : memref<256x64xf32, #tpu.memory_space<vmem>>, vector<256x64xf32>
      %c0_12 = arith.constant 0 : index
      %c0_13 = arith.constant 0 : index
      %13 = vector.load %arg5[%c0_12, %c0_13] : memref<1x64xf32, #tpu.memory_space<vmem>>, vector<1x64xf32>
      %14 = vector.broadcast %13 : vector<1x64xf32> to vector<256x64xf32>
      %15 = arith.mulf %12, %14 : vector<256x64xf32>
      %c0_14 = arith.constant 0 : index
      %c0_15 = arith.constant 0 : index
      %16 = vector.load %arg6[%c0_14, %c0_15] : memref<1x64xf32, #tpu.memory_space<vmem>>, vector<1x64xf32>
      %17 = vector.broadcast %16 : vector<1x64xf32> to vector<256x64xf32>
      %18 = arith.addf %15, %17 : vector<256x64xf32>
      %cst_16 = arith.constant 0.000000e+00 : f32
      %19 = vector.broadcast %cst_16 : f32 to vector<256x64xf32>
      %20 = arith.maximumf %18, %19 : vector<256x64xf32>
      %21 = arith.truncf %20 : vector<256x64xf32> to vector<256x64xbf16>
      %c0_17 = arith.constant 0 : index
      %c0_18 = arith.constant 0 : index
      %22 = vector.load %arg7[%c0_17, %c0_18] : memref<256x64xbf16, #tpu.memory_space<vmem>>, vector<256x64xbf16>
      tpu.vector_store %arg7[%c0_17, %c0_18], %21 {strides = array<i32>} : memref<256x64xbf16, #tpu.memory_space<vmem>>, vector<256x64xbf16>,
    } else {
    }
    return
  }
  func.func @transform_0(%arg0: i32, %arg1: i32, %arg2: i32) -> (i32, i32) {
    %c0_i32 = arith.constant 0 : i32
    return %arg0, %arg2 : i32, i32
  }
  func.func @transform_1(%arg0: i32, %arg1: i32, %arg2: i32) -> (i32, i32) {
    %c0_i32 = arith.constant 0 : i32
    return %arg2, %arg1 : i32, i32
  }
  func.func @transform_2(%arg0: i32, %arg1: i32, %arg2: i32) -> (i32, i32) {
    %c0_i32 = arith.constant 0 : i32
    %c0_i32_0 = arith.constant 0 : i32
    return %c0_i32, %arg1 : i32, i32
  }
  func.func @transform_3(%arg0: i32, %arg1: i32, %arg2: i32) -> (i32, i32) {
    %c0_i32 = arith.constant 0 : i32
    %c0_i32_0 = arith.constant 0 : i32
    return %c0_i32, %arg1 : i32, i32
  }
  func.func @transform_4(%arg0: i32, %arg1: i32, %arg2: i32) -> (i32, i32) {
    %c0_i32 = arith.constant 0 : i32
    return %arg0, %arg1 : i32, i32
  }
}

</mosaic_0001>

<bundles_post_ra>
// kernel: tpu_custom_call.1
= control target key start
LH: loop header
LB: loop body
LE: loop exit
PB: predicated region body
PF: predicated region fallthrough
CT: control target
= control target key end

     0   :  { %s1641_s15 = smov 0   ;;  %s1643_s16 = smov 0   ;;  %s1984_s0 = inlined_call_operand.vmem [shape: bf16[512,147], index: 0, kind: input, shape index: {}]   ;;  %s1985_s1 = inlined_call_operand.vmem [shape: bf16[147,64], index: 1, kind: input, shape index: {}]   ;;  %s1986_s2 = inlined_call_operand.vmem [shape: f32[1,64], index: 2, kind: input, shape index: {}]   ;;  %s1987_s3 = inlined_call_operand.vmem [shape: f32[1,64], index: 3, kind: input, shape index: {}]   ;;  %s1988_s4 = inlined_call_operand.vmem [shape: bf16[512,64], index: 4, kind: output, shape index: {}]  }
   0x1   :  { %s1645_s17 = smov 0  }
   0x2 LB: > { %s33_s18 = sadd.s32 1, %s1607_s16  ;;  %p1351_p0 = scmp.ge.s32.totalorder %s1611_s17, 1  ;;  %s1611_s17 = sphi %s1645_s17, %s14_s17   ;;  %s1607_s16 = sphi %s1643_s16, %s1990_s16   ;;  %s1603_s15 = sphi %s1641_s15, %s1989_s15  }
   0x3   : > { %p35_p1 = scmp.ge.s32.totalorder %s33_s18, 2  ;;  %p224_p2 = scmp.lt.s32.totalorder %s1611_s17, 3 }
   0x5   : > { %s1992_s18 = smov (%p35_p1, %s33_s18), 0  ;;  %p225_p3 = pnand %p1351_p0, %p224_p2 }
   0x6   : > { %s1352_s25 = sshll.u32 (!%p225_p3), %s1603_s15, 5 }
   0x7   : > { %228 = sbr.rel (%p225_p3) target bundleno = 326 (0x146), region = 36  ;;  %p274_p4 = scmp.lt.s32.totalorder (!%p225_p3), %s1352_s25, 63 }
   0xc   : > { %v1531_v0 = vld [vmem:[%s1985_s1 + $0x38] sm:$0xff]   ;;  %v1613_v1 = vmov 0   ;;  %v1532_v2 = vld [vmem:[%s1985_s1 + $0x30] sm:$0xff]   ;;  %v1533_v3 = vld [vmem:[%s1985_s1 + $0x28] sm:$0xff]   ;;  %s1994_s25 = smov (!%p274_p4, %s1352_s25), 63  ;;  %vm313_vm0 = vcmask 523264  }
   0xd   : > { %686 = vmatprep.subr.bf16.mxu0 %v1613_v1  ;;  %1484 = vmatprep.subr.bf16.mxu1 %v1613_v1  ;;  %v1534_v4 = vld [vmem:[%s1985_s1 + $0x20] sm:$0xff]   ;;  %s1451_s28 = sshll.u32 %s1994_s25, 3  ;;  %v1614_v5 = vmov 0.0   ;;  %v1535_v6 = vld [vmem:[%s1985_s1 + $0x18] sm:$0xff]   ;;  %vm630_vm1 = vcmask 154624   ;;  %v1536_v9 = vld [vmem:[%s1985_s1 + $0x10] sm:$0xff]  }
   0xe   : > { %687 = vmatpush1.bf16.msra.mxu0 %v1531_v0  ;;  %1494 = vmatpush1.bf16.msra.mxu1 %v1531_v0  ;;  %314 = vst.msk [vmem:[#allocation2] sm:$0xff] %vm313_vm0, %v1614_v5  ;;  %315 = vst.msk [vmem:[#allocation2 + $0x8] sm:$0xff] %vm313_vm0, %v1614_v5  ;;  %s1719_s5 = scalar_lea.vmem %s1984_s0, %s1451_s28  ;;  %vm679_vm2 = vcmask 1040384   ;;  %v1537_v10 = vld [vmem:[%s1985_s1 + $0x8] sm:$0xff]   ;;  %vm680_vm3 = vcmask 1041408   ;;  %v1615_v11 = vmov 65535  }
   0xf   : > { %688 = vmatprep.subr.bf16.mxu0 %v1613_v1  ;;  %1485 = vmatprep.subr.bf16.mxu1 %v1613_v1  ;;  %316 = vst.msk [vmem:[#allocation2 + $0x10] sm:$0xff] %vm313_vm0, %v1614_v5  ;;  %317 = vst.msk [vmem:[#allocation2 + $0x18] sm:$0xff] %vm313_vm0, %v1614_v5  ;;  %v1543_v7 = vld [vmem:[%s1719_s5 + $0x4] ss:$8 sps:$4 sm:$0xff]   ;;  %v681_v12 = vsel %vm679_vm2, 4294967295, %v1615_v11  ;;  %s1356_s26 = sshll.u32 %s1994_s25, 2 }
  0x10   : > { %318 = vst.msk [vmem:[#allocation2 + $0x20] sm:$0xff] %vm313_vm0, %v1614_v5  ;;  %319 = vst.msk [vmem:[#allocation2 + $0x28] sm:$0xff] %vm313_vm0, %v1614_v5  ;;  %v1546_v8 = vld [vmem:[%s1719_s5 + $0x84] ss:$8 sps:$4 sm:$0xff]   ;;  %1399 = vmatprep.mubr.msk.bf16.mxu0 %vm630_vm1, %v1543_v7  ;;  %v682_v15 = vsel %vm680_vm3, %v681_v12, 0  ;;  %s1827_s28 = scalar_lea.vmem %s1988_s4, %s1356_s26  ;;  %vm1185_vm4 = vcmask 519168  }
  0x11   : > { %320 = vst.msk [vmem:[#allocation2 + $0x30] sm:$0xff] %vm313_vm0, %v1614_v5  ;;  %321 = vst.msk [vmem:[#allocation2 + $0x38] sm:$0xff] %vm313_vm0, %v1614_v5  ;;  %1407 = vmatprep.mubr.msk.bf16.mxu1 %vm630_vm1, %v1546_v8  ;;  %v1538_v13 = vld [vmem:[%s1985_s1] sm:$0xff]   ;;  %v1539_v14 = vld [vmem:[%s1985_s1 + $0x48] ss:$0 sps:$4 sm:$0x33]  }
  0x12   : > { %689 = vmatpush1.bf16.msra.mxu0 %v1532_v2  ;;  %1495 = vmatpush1.bf16.msra.mxu1 %v1532_v2  ;;  %322 = vst.msk [vmem:[#allocation2 + $0x40] sm:$0xff] %vm313_vm0, %v1614_v5  ;;  %323 = vst.msk [vmem:[#allocation2 + $0x48] sm:$0xff] %vm313_vm0, %v1614_v5  ;;  %v684_v16 = vand.u32 %v1539_v14, %v682_v15  ;;  %v1540_v17 = vld [vmem:[%s1985_s1 + $0x40] sm:$0xff]   ;;  %v1547_v20 = vld [vmem:[%s1719_s5 + $0x14] ss:$8 sps:$4 sm:$0xff]  }
  0x13   : > { %690 = vmatprep.subr.bf16.mxu0 %v1613_v1  ;;  %1486 = vmatprep.subr.bf16.mxu1 %v1613_v1  ;;  %324 = vst.msk [vmem:[#allocation2 + $0x50] sm:$0xff] %vm313_vm0, %v1614_v5  ;;  %325 = vst.msk [vmem:[#allocation2 + $0x58] sm:$0xff] %vm313_vm0, %v1614_v5  ;;  %v1541_v18 = vld [vmem:[%s1719_s5] ss:$8 sps:$4 sm:$0xff]   ;;  %v1549_v21 = vld [vmem:[%s1719_s5 + $0x94] ss:$8 sps:$4 sm:$0xff]  }
  0x14   : > { %326 = vst.msk [vmem:[#allocation2 + $0x60] sm:$0xff] %vm313_vm0, %v1614_v5  ;;  %327 = vst.msk [vmem:[#allocation2 + $0x68] sm:$0xff] %vm313_vm0, %v1614_v5  ;;  %v1544_v19 = vld [vmem:[%s1719_s5 + $0x80] ss:$8 sps:$4 sm:$0xff]   ;;  %v1551_v22 = vld [vmem:[%s1719_s5 + $0x10] ss:$8 sps:$4 sm:$0xff]  }
  0x15   : > { %328 = vst.msk [vmem:[#allocation2 + $0x70] sm:$0xff] %vm313_vm0, %v1614_v5  ;;  %329 = vst.msk [vmem:[#allocation2 + $0x78] sm:$0xff] %vm313_vm0, %v1614_v5  ;;  %v1552_v23 = vld [vmem:[%s1719_s5 + $0x90] ss:$8 sps:$4 sm:$0xff]   ;;  %v1553_v24 = vld [vmem:[%s1719_s5 + $0x24] ss:$8 sps:$4 sm:$0xff]  }
  0x16   : > { %691 = vmatpush1.bf16.msra.mxu0 %v1533_v3  ;;  %1496 = vmatpush1.bf16.msra.mxu1 %v1533_v3  ;;  %330 = vst.msk [vmem:[#allocation2 + $0x80] sm:$0xff] %vm313_vm0, %v1614_v5  ;;  %331 = vst.msk [vmem:[#allocation2 + $0x88] sm:$0xff] %vm313_vm0, %v1614_v5  ;;  %v1555_v25 = vld [vmem:[%s1719_s5 + $0xa4] ss:$8 sps:$4 sm:$0xff]   ;;  %v1557_v26 = vld [vmem:[%s1719_s5 + $0x20] ss:$8 sps:$4 sm:$0xff]  }
  0x17   : > { %692 = vmatprep.subr.bf16.mxu0 %v1613_v1  ;;  %1487 = vmatprep.subr.bf16.mxu1 %v1613_v1  ;;  %332 = vst.msk [vmem:[#allocation2 + $0x90] sm:$0xff] %vm313_vm0, %v1614_v5  ;;  %333 = vst.msk [vmem:[#allocation2 + $0x98] sm:$0xff] %vm313_vm0, %v1614_v5  ;;  %v1558_v27 = vld [vmem:[%s1719_s5 + $0xa0] ss:$8 sps:$4 sm:$0xff]   ;;  %v1559_v28 = vld [vmem:[%s1719_s5 + $0x34] ss:$8 sps:$4 sm:$0xff]  }
  0x18   : > { %334 = vst.msk [vmem:[#allocation2 + $0xa0] sm:$0xff] %vm313_vm0, %v1614_v5  ;;  %335 = vst.msk [vmem:[#allocation2 + $0xa8] sm:$0xff] %vm313_vm0, %v1614_v5  ;;  %v1561_v29 = vld [vmem:[%s1719_s5 + $0xb4] ss:$8 sps:$4 sm:$0xff]   ;;  %v1563_v30 = vld [vmem:[%s1719_s5 + $0x30] ss:$8 sps:$4 sm:$0xff]  }
  0x19   : > { %336 = vst.msk [vmem:[#allocation2 + $0xb0] sm:$0xff] %vm313_vm0, %v1614_v5  ;;  %337 = vst.msk [vmem:[#allocation2 + $0xb8] sm:$0xff] %vm313_vm0, %v1614_v5  ;;  %v1564_v31 = vld [vmem:[%s1719_s5 + $0xb0] ss:$8 sps:$4 sm:$0xff]   ;;  %v1565_v32 = vld [vmem:[%s1719_s5 + $0x44] ss:$8 sps:$4 sm:$0xff]  }
  0x1a   : > { %338 = vst.msk [vmem:[#allocation2 + $0xc0] sm:$0xff] %vm313_vm0, %v1614_v5  ;;  %339 = vst.msk [vmem:[#allocation2 + $0xc8] sm:$0xff] %vm313_vm0, %v1614_v5  ;;  %693 = vmatpush1.bf16.msra.mxu0 %v1534_v4  ;;  %1497 = vmatpush1.bf16.msra.mxu1 %v1534_v4  ;;  %v1567_v33 = vld [vmem:[%s1719_s5 + $0xc4] ss:$8 sps:$4 sm:$0xff]   ;;  %v1569_v34 = vld [vmem:[%s1719_s5 + $0x40] ss:$8 sps:$4 sm:$0xff]  }
  0x1b   : > { %340 = vst.msk [vmem:[#allocation2 + $0xd0] sm:$0xff] %vm313_vm0, %v1614_v5  ;;  %341 = vst.msk [vmem:[#allocation2 + $0xd8] sm:$0xff] %vm313_vm0, %v1614_v5  ;;  %694 = vmatprep.subr.bf16.mxu0 %v1613_v1  ;;  %1488 = vmatprep.subr.bf16.mxu1 %v1613_v1  ;;  %v1570_v35 = vld [vmem:[%s1719_s5 + $0xc0] ss:$8 sps:$4 sm:$0xff]   ;;  %v1571_v36 = vld [vmem:[%s1719_s5 + $0x54] ss:$8 sps:$4 sm:$0xff]  }
  0x1c   : > { %342 = vst.msk [vmem:[#allocation2 + $0xe0] sm:$0xff] %vm313_vm0, %v1614_v5  ;;  %343 = vst.msk [vmem:[#allocation2 + $0xe8] sm:$0xff] %vm313_vm0, %v1614_v5  ;;  %v1573_v37 = vld [vmem:[%s1719_s5 + $0xd4] ss:$8 sps:$4 sm:$0xff]   ;;  %v1575_v38 = vld [vmem:[%s1719_s5 + $0x50] ss:$8 sps:$4 sm:$0xff]  }
  0x1d   : > { %344 = vst.msk [vmem:[#allocation2 + $0xf0] sm:$0xff] %vm313_vm0, %v1614_v5  ;;  %345 = vst.msk [vmem:[#allocation2 + $0xf8] sm:$0xff] %vm313_vm0, %v1614_v5  ;;  %v1576_v39 = vld [vmem:[%s1719_s5 + $0xd0] ss:$8 sps:$4 sm:$0xff]   ;;  %v1577_v40 = vld [vmem:[%s1719_s5 + $0x64] ss:$8 sps:$4 sm:$0xff]  }
  0x1e   : > { %695 = vmatpush1.bf16.msra.mxu0 %v1535_v6  ;;  %1498 = vmatpush1.bf16.msra.mxu1 %v1535_v6  ;;  %v1579_v41 = vld [vmem:[%s1719_s5 + $0xe4] ss:$8 sps:$4 sm:$0xff]   ;;  %v1581_v42 = vld [vmem:[%s1719_s5 + $0x60] ss:$8 sps:$4 sm:$0xff]   ;;  %v1583_v44 = vld [vmem:[%s1719_s5 + $0x74] ss:$8 sps:$4 sm:$0xff]  }
  0x1f   : > { %696 = vmatprep.subr.bf16.mxu0 %v1613_v1  ;;  %1489 = vmatprep.subr.bf16.mxu1 %v1613_v1  ;;  %v1582_v43 = vld [vmem:[%s1719_s5 + $0xe0] ss:$8 sps:$4 sm:$0xff]   ;;  %v1585_v45 = vld [vmem:[%s1719_s5 + $0xf4] ss:$8 sps:$4 sm:$0xff]   ;;  %v1587_v46 = vld [vmem:[%s1719_s5 + $0x70] ss:$8 sps:$4 sm:$0xff]  }
  0x20   : > { %v1588_v47 = vld [vmem:[%s1719_s5 + $0xf0] ss:$8 sps:$4 sm:$0xff]   ;;  %v346_v48 = vld [vmem:[#allocation2] sm:$0xff]  ;;  %v347_v56 = vld [vmem:[#allocation2 + $0x8] sm:$0xff] }
  0x21   : > { %v362_v49 = vld [vmem:[#allocation2 + $0x80] sm:$0xff]  ;;  %v363_v57 = vld [vmem:[#allocation2 + $0x88] sm:$0xff]  ;;  %v348_v0 = vld [vmem:[#allocation2 + $0x10] sm:$0xff] }
  0x22   : > { %697 = vmatpush1.bf16.msra.mxu0 %v1536_v9  ;;  %1499 = vmatpush1.bf16.msra.mxu1 %v1536_v9  ;;  %v1806_v2 = vld [vmem:[%s1986_s2] ss:$0 sm:$0xff]  ;;  %v349_v8 = vld [vmem:[#allocation2 + $0x18] sm:$0xff] }
  0x23   : > { %698 = vmatprep.subr.bf16.mxu0 %v1613_v1  ;;  %1490 = vmatprep.subr.bf16.mxu1 %v1613_v1  ;;  %v1811_v5 = vld [vmem:[%s1987_s3] ss:$0 sm:$0xff] }
  0x26   : > { %699 = vmatpush1.bf16.msra.mxu0 %v1537_v10  ;;  %1500 = vmatpush1.bf16.msra.mxu1 %v1537_v10 }
  0x27   : > { %700 = vmatprep.subr.bf16.mxu0 %v1613_v1  ;;  %1491 = vmatprep.subr.bf16.mxu1 %v1613_v1 }
  0x2a   : > { %701 = vmatpush1.bf16.msra.mxu0 %v1538_v13  ;;  %1501 = vmatpush1.bf16.msra.mxu1 %v1538_v13  ;;  %v365_v13 = vld [vmem:[#allocation2 + $0x98] sm:$0xff] }
  0x2b   : > { %714 = vmatprep.subr.bf16.mxu0 %v1613_v1  ;;  %1492 = vmatprep.subr.bf16.mxu1 %v1613_v1 }
  0x2e   : > { %715 = vmatpush2.bf16.msra.mxu0 %v684_v16  ;;  %1502 = vmatpush2.bf16.msra.mxu1 %v684_v16 }
  0x2f   : > { %716 = vmatprep.subr.bf16.mxu0 %v1613_v1  ;;  %1493 = vmatprep.subr.bf16.mxu1 %v1613_v1  ;;  %v364_v1 = vld [vmem:[#allocation2 + $0x90] sm:$0xff] }
  0x32   : > { %717 = vmatpush2.bf16.msra.mxu0 %v1540_v17  ;;  %1503 = vmatpush2.bf16.msra.mxu1 %v1540_v17 }
  0x35   : > { %719 = vmatmul.mubr.bf16.vlgmr.msra.gmra.mxu0 %v1541_v18  ;;  %783 = vmatmul.mubr.bf16.vlgmr.msra.gmra.mxu1 %v1544_v19 }
  0x36   : > { %1400 = vmatprep.mubr.msk.bf16.mxu0 %vm630_vm1, %v1547_v20  ;;  %1408 = vmatprep.mubr.msk.bf16.mxu1 %vm630_vm1, %v1549_v21 }
  0x3d   : > { %727 = vmatmul.mubr.bf16.gmra.mxu0 %v1551_v22  ;;  %791 = vmatmul.mubr.bf16.gmra.mxu1 %v1552_v23 }
  0x3e   : > { %1401 = vmatprep.mubr.msk.bf16.mxu0 %vm630_vm1, %v1553_v24  ;;  %1409 = vmatprep.mubr.msk.bf16.mxu1 %vm630_vm1, %v1555_v25 }
  0x45   : > { %735 = vmatmul.mubr.bf16.gmra.mxu0 %v1557_v26  ;;  %799 = vmatmul.mubr.bf16.gmra.mxu1 %v1558_v27 }
  0x46   : > { %1402 = vmatprep.mubr.msk.bf16.mxu0 %vm630_vm1, %v1559_v28  ;;  %1410 = vmatprep.mubr.msk.bf16.mxu1 %vm630_vm1, %v1561_v29 }
  0x4d   : > { %743 = vmatmul.mubr.bf16.gmra.mxu0 %v1563_v30  ;;  %807 = vmatmul.mubr.bf16.gmra.mxu1 %v1564_v31  ;;  %v350_v30 = vld [vmem:[#allocation2 + $0x20] sm:$0xff] }
  0x4e   : > { %1403 = vmatprep.mubr.msk.bf16.mxu0 %vm630_vm1, %v1565_v32  ;;  %1411 = vmatprep.mubr.msk.bf16.mxu1 %vm630_vm1, %v1567_v33  ;;  %v366_v31 = vld [vmem:[#allocation2 + $0xa0] sm:$0xff] }
  0x55   : > { %751 = vmatmul.mubr.bf16.gmra.mxu0 %v1569_v34  ;;  %815 = vmatmul.mubr.bf16.gmra.mxu1 %v1570_v35 }
  0x56   : > { %1404 = vmatprep.mubr.msk.bf16.mxu0 %vm630_vm1, %v1571_v36  ;;  %1412 = vmatprep.mubr.msk.bf16.mxu1 %vm630_vm1, %v1573_v37 }
  0x5d   : > { %759 = vmatmul.mubr.bf16.gmra.mxu0 %v1575_v38  ;;  %823 = vmatmul.mubr.bf16.gmra.mxu1 %v1576_v39 }
  0x5e   : > { %1405 = vmatprep.mubr.msk.bf16.mxu0 %vm630_vm1, %v1577_v40  ;;  %1413 = vmatprep.mubr.msk.bf16.mxu1 %vm630_vm1, %v1579_v41 }
  0x65   : > { %767 = vmatmul.mubr.bf16.gmra.mxu0 %v1581_v42  ;;  %831 = vmatmul.mubr.bf16.gmra.mxu1 %v1582_v43 }
  0x66   : > { %1406 = vmatprep.mubr.msk.bf16.mxu0 %vm630_vm1, %v1583_v44  ;;  %1414 = vmatprep.mubr.msk.bf16.mxu1 %vm630_vm1, %v1585_v45 }
  0x6d   : > { %775 = vmatmul.mubr.bf16.gmra.mxu0 %v1587_v46  ;;  %839 = vmatmul.mubr.bf16.gmra.mxu1 %v1588_v47 }
  0xf5   : > { %v720_v50 = vpop.f32.mrf.mxu0  ;;  %v784_v51 = vpop.f32.mrf.mxu1 }
  0xf6   : > { %v847_v52 = vadd.f32 %v720_v50, %v346_v48  ;;  %v863_v53 = vadd.f32 %v784_v51, %v362_v49  ;;  %v351_v48 = vld [vmem:[#allocation2 + $0x28] sm:$0xff] }
  0xf7   : > { %v722_v54 = vpop.f32.mrf.mxu0  ;;  %v786_v55 = vpop.f32.mrf.mxu1  ;;  %v367_v49 = vld [vmem:[#allocation2 + $0xa8] sm:$0xff] }
  0xf8   : > { %880 = vst.msk [vmem:[#allocation2] sm:$0xff] %vm313_vm0, %v847_v52  ;;  %896 = vst.msk [vmem:[#allocation2 + $0x80] sm:$0xff] %vm313_vm0, %v863_v53 }
  0xf9   : > { %v723_v58 = vpop.f32.mrf.mxu0  ;;  %v787_v59 = vpop.f32.mrf.mxu1 }
  0xfa   : > { %v848_v60 = vadd.f32 %v723_v58, %v347_v56  ;;  %v864_v61 = vadd.f32 %v787_v59, %v363_v57 }
  0xfb   : > { %v725_v62 = vpop.f32.mrf.mxu0  ;;  %v789_v63 = vpop.f32.mrf.mxu1 }
  0xfc   : > { %881 = vst.msk [vmem:[#allocation2 + $0x8] sm:$0xff] %vm313_vm0, %v848_v60  ;;  %897 = vst.msk [vmem:[#allocation2 + $0x88] sm:$0xff] %vm313_vm0, %v864_v61 }
  0xfd   : > { %v728_v3 = vpop.f32.mrf.mxu0  ;;  %v792_v4 = vpop.f32.mrf.mxu1 }
  0xfe   : > { %v849_v6 = vadd.f32 %v728_v3, %v348_v0  ;;  %v865_v7 = vadd.f32 %v792_v4, %v364_v1  ;;  %v352_v3 = vld [vmem:[#allocation2 + $0x30] sm:$0xff] }
  0xff   : > { %v915_v9 = vld [vmem:[#allocation2] sm:$0xff]  ;;  %v730_v11 = vpop.f32.mrf.mxu0  ;;  %v794_v12 = vpop.f32.mrf.mxu1  ;;  %v368_v4 = vld [vmem:[#allocation2 + $0xb0] sm:$0xff] }
 0x100   : > { %v931_v10 = vld [vmem:[#allocation2 + $0x80] sm:$0xff]  ;;  %v954_v14 = vmul.f32 %v1806_v2, %v915_v9  ;;  %882 = vst.msk [vmem:[#allocation2 + $0x10] sm:$0xff] %vm313_vm0, %v849_v6  ;;  %898 = vst.msk [vmem:[#allocation2 + $0x90] sm:$0xff] %vm313_vm0, %v865_v7 }
 0x101   : > { %v970_v15 = vmul.f32 %v1806_v2, %v931_v10  ;;  %v731_v16 = vpop.f32.mrf.mxu0  ;;  %v795_v17 = vpop.f32.mrf.mxu1 }
 0x102   : > { %v993_v18 = vadd.f32 %v1811_v5, %v954_v14  ;;  %v850_v20 = vadd.f32 %v731_v16, %v349_v8  ;;  %v866_v21 = vadd.f32 %v795_v17, %v365_v13  ;;  %v353_v16 = vld [vmem:[#allocation2 + $0x38] sm:$0xff] }
 0x103   : > { %v1009_v19 = vadd.f32 %v1811_v5, %v970_v15  ;;  %v916_v22 = vld [vmem:[#allocation2 + $0x8] sm:$0xff]  ;;  %v733_v24 = vpop.f32.mrf.mxu0  ;;  %v797_v25 = vpop.f32.mrf.mxu1  ;;  %v369_v17 = vld [vmem:[#allocation2 + $0xb8] sm:$0xff] }
 0x104   : > { %v932_v23 = vld [vmem:[#allocation2 + $0x88] sm:$0xff]  ;;  %v1025_v26 = vmax.f32 %v993_v18, 0.0  ;;  %v955_v28 = vmul.f32 %v1806_v2, %v916_v22  ;;  %883 = vst.msk [vmem:[#allocation2 + $0x18] sm:$0xff] %vm313_vm0, %v850_v20  ;;  %899 = vst.msk [vmem:[#allocation2 + $0x98] sm:$0xff] %vm313_vm0, %v866_v21 }
 0x105   : > { %v1041_v27 = vmax.f32 %v1009_v19, 0.0  ;;  %v971_v29 = vmul.f32 %v1806_v2, %v932_v23  ;;  %v736_v32 = vpop.f32.mrf.mxu0  ;;  %v800_v33 = vpop.f32.mrf.mxu1 }
 0x106   : > { %v1452_v34 = vpack.c.bf16 %v1025_v26, %v1025_v26  ;;  %v994_v36 = vadd.f32 %v1811_v5, %v955_v28  ;;  %v851_v40 = vadd.f32 %v736_v32, %v350_v30  ;;  %v867_v41 = vadd.f32 %v800_v33, %v366_v31 }
 0x107   : > { %v1468_v35 = vpack.c.bf16 %v1041_v27, %v1041_v27  ;;  %v1010_v37 = vadd.f32 %v1811_v5, %v971_v29  ;;  %v917_v38 = vld [vmem:[#allocation2 + $0x10] sm:$0xff]  ;;  %v738_v42 = vpop.f32.mrf.mxu0  ;;  %v802_v43 = vpop.f32.mrf.mxu1 }
 0x108   : > { %v933_v39 = vld [vmem:[#allocation2 + $0x90] sm:$0xff]  ;;  %1186 = vst.msk [vmem:[%s1827_s28] sm:$0xf] %vm1185_vm4, %v1452_v34  ;;  %v1026_v44 = vmax.f32 %v994_v36, 0.0  ;;  %v956_v46 = vmul.f32 %v1806_v2, %v917_v38  ;;  %v354_v34 = vld [vmem:[#allocation2 + $0x40] sm:$0xff] }
 0x109   : > { %1202 = vst.msk [vmem:[%s1827_s28 + $0x40] sm:$0xf] %vm1185_vm4, %v1468_v35  ;;  %v1042_v45 = vmax.f32 %v1010_v37, 0.0  ;;  %v972_v47 = vmul.f32 %v1806_v2, %v933_v39  ;;  %v739_v50 = vpop.f32.mrf.mxu0  ;;  %v803_v51 = vpop.f32.mrf.mxu1  ;;  %v370_v35 = vld [vmem:[#allocation2 + $0xc0] sm:$0xff] }
 0x10a   : > { %884 = vst.msk [vmem:[#allocation2 + $0x20] sm:$0xff] %vm313_vm0, %v851_v40  ;;  %900 = vst.msk [vmem:[#allocation2 + $0xa0] sm:$0xff] %vm313_vm0, %v867_v41  ;;  %v1453_v52 = vpack.c.bf16 %v1026_v44, %v1026_v44  ;;  %v995_v54 = vadd.f32 %v1811_v5, %v956_v46  ;;  %v852_v58 = vadd.f32 %v739_v50, %v351_v48 }
 0x10b   : > { %v1469_v53 = vpack.c.bf16 %v1042_v45, %v1042_v45  ;;  %v1011_v55 = vadd.f32 %v1811_v5, %v972_v47  ;;  %v918_v56 = vld [vmem:[#allocation2 + $0x18] sm:$0xff]  ;;  %v868_v59 = vadd.f32 %v803_v51, %v367_v49  ;;  %v741_v60 = vpop.f32.mrf.mxu0  ;;  %v805_v61 = vpop.f32.mrf.mxu1 }
 0x10c   : > { %v934_v57 = vld [vmem:[#allocation2 + $0x98] sm:$0xff]  ;;  %1187 = vst.msk [vmem:[%s1827_s28 + $0x4] sm:$0xf] %vm1185_vm4, %v1453_v52  ;;  %v1027_v62 = vmax.f32 %v995_v54, 0.0  ;;  %v957_v0 = vmul.f32 %v1806_v2, %v918_v56  ;;  %v355_v52 = vld [vmem:[#allocation2 + $0x48] sm:$0xff] }
 0x10d   : > { %1203 = vst.msk [vmem:[%s1827_s28 + $0x44] sm:$0xf] %vm1185_vm4, %v1469_v53  ;;  %v1043_v63 = vmax.f32 %v1011_v55, 0.0  ;;  %v973_v1 = vmul.f32 %v1806_v2, %v934_v57  ;;  %v744_v6 = vpop.f32.mrf.mxu0  ;;  %v808_v7 = vpop.f32.mrf.mxu1  ;;  %v371_v53 = vld [vmem:[#allocation2 + $0xc8] sm:$0xff] }
 0x10e   : > { %885 = vst.msk [vmem:[#allocation2 + $0x28] sm:$0xff] %vm313_vm0, %v852_v58  ;;  %901 = vst.msk [vmem:[#allocation2 + $0xa8] sm:$0xff] %vm313_vm0, %v868_v59  ;;  %v1454_v8 = vpack.c.bf16 %v1027_v62, %v1027_v62  ;;  %v996_v10 = vadd.f32 %v1811_v5, %v957_v0  ;;  %v853_v12 = vadd.f32 %v744_v6, %v352_v3  ;;  %v356_v0 = vld [vmem:[#allocation2 + $0x50] sm:$0xff] }
 0x10f   : > { %v1470_v9 = vpack.c.bf16 %v1043_v63, %v1043_v63  ;;  %v1012_v11 = vadd.f32 %v1811_v5, %v973_v1  ;;  %v869_v13 = vadd.f32 %v808_v7, %v368_v4  ;;  %v746_v14 = vpop.f32.mrf.mxu0  ;;  %v810_v15 = vpop.f32.mrf.mxu1 }
 0x110   : > { %1188 = vst.msk [vmem:[%s1827_s28 + $0x8] sm:$0xf] %vm1185_vm4, %v1454_v8  ;;  %v1028_v18 = vmax.f32 %v996_v10, 0.0 }
 0x111   : > { %1204 = vst.msk [vmem:[%s1827_s28 + $0x48] sm:$0xf] %vm1185_vm4, %v1470_v9  ;;  %v1044_v19 = vmax.f32 %v1012_v11, 0.0  ;;  %v919_v20 = vld [vmem:[#allocation2 + $0x20] sm:$0xff]  ;;  %v747_v24 = vpop.f32.mrf.mxu0  ;;  %v811_v25 = vpop.f32.mrf.mxu1  ;;  %v372_v11 = vld [vmem:[#allocation2 + $0xd0] sm:$0xff] }
 0x112   : > { %v935_v21 = vld [vmem:[#allocation2 + $0xa0] sm:$0xff]  ;;  %v958_v22 = vmul.f32 %v1806_v2, %v919_v20  ;;  %886 = vst.msk [vmem:[#allocation2 + $0x30] sm:$0xff] %vm313_vm0, %v853_v12  ;;  %902 = vst.msk [vmem:[#allocation2 + $0xb0] sm:$0xff] %vm313_vm0, %v869_v13  ;;  %v1455_v26 = vpack.c.bf16 %v1028_v18, %v1028_v18  ;;  %v854_v28 = vadd.f32 %v747_v24, %v353_v16 }
 0x113   : > { %v974_v23 = vmul.f32 %v1806_v2, %v935_v21  ;;  %v1471_v27 = vpack.c.bf16 %v1044_v19, %v1044_v19  ;;  %v870_v29 = vadd.f32 %v811_v25, %v369_v17  ;;  %v749_v32 = vpop.f32.mrf.mxu0  ;;  %v813_v33 = vpop.f32.mrf.mxu1 }
 0x114   : > { %v997_v30 = vadd.f32 %v1811_v5, %v958_v22  ;;  %1189 = vst.msk [vmem:[%s1827_s28 + $0xc] sm:$0xf] %vm1185_vm4, %v1455_v26  ;;  %v357_v32 = vld [vmem:[#allocation2 + $0x58] sm:$0xff] }
 0x115   : > { %v1013_v31 = vadd.f32 %v1811_v5, %v974_v23  ;;  %1205 = vst.msk [vmem:[%s1827_s28 + $0x4c] sm:$0xf] %vm1185_vm4, %v1471_v27  ;;  %v920_v36 = vld [vmem:[#allocation2 + $0x28] sm:$0xff]  ;;  %v752_v42 = vpop.f32.mrf.mxu0  ;;  %v816_v43 = vpop.f32.mrf.mxu1  ;;  %v373_v33 = vld [vmem:[#allocation2 + $0xd8] sm:$0xff] }
 0x116   : > { %v936_v37 = vld [vmem:[#allocation2 + $0xa8] sm:$0xff]  ;;  %887 = vst.msk [vmem:[#allocation2 + $0x38] sm:$0xff] %vm313_vm0, %v854_v28  ;;  %903 = vst.msk [vmem:[#allocation2 + $0xb8] sm:$0xff] %vm313_vm0, %v870_v29  ;;  %v1029_v38 = vmax.f32 %v997_v30, 0.0  ;;  %v959_v40 = vmul.f32 %v1806_v2, %v920_v36  ;;  %v855_v44 = vadd.f32 %v752_v42, %v354_v34  ;;  %v871_v45 = vadd.f32 %v816_v43, %v370_v35 }
 0x117   : > { %v1045_v39 = vmax.f32 %v1013_v31, 0.0  ;;  %v975_v41 = vmul.f32 %v1806_v2, %v936_v37  ;;  %v754_v50 = vpop.f32.mrf.mxu0  ;;  %v818_v51 = vpop.f32.mrf.mxu1 }
 0x118   : > { %v1456_v46 = vpack.c.bf16 %v1029_v38, %v1029_v38  ;;  %v998_v48 = vadd.f32 %v1811_v5, %v959_v40  ;;  %888 = vst.msk [vmem:[#allocation2 + $0x40] sm:$0xff] %vm313_vm0, %v855_v44  ;;  %904 = vst.msk [vmem:[#allocation2 + $0xc0] sm:$0xff] %vm313_vm0, %v871_v45  ;;  %v358_v50 = vld [vmem:[#allocation2 + $0x60] sm:$0xff] }
 0x119   : > { %v1472_v47 = vpack.c.bf16 %v1045_v39, %v1045_v39  ;;  %v1014_v49 = vadd.f32 %v1811_v5, %v975_v41  ;;  %v921_v54 = vld [vmem:[#allocation2 + $0x30] sm:$0xff]  ;;  %v755_v60 = vpop.f32.mrf.mxu0  ;;  %v819_v61 = vpop.f32.mrf.mxu1  ;;  %v374_v51 = vld [vmem:[#allocation2 + $0xe0] sm:$0xff] }
 0x11a   : > { %v937_v55 = vld [vmem:[#allocation2 + $0xb0] sm:$0xff]  ;;  %1190 = vst.msk [vmem:[%s1827_s28 + $0x10] sm:$0xf] %vm1185_vm4, %v1456_v46  ;;  %v1030_v56 = vmax.f32 %v998_v48, 0.0  ;;  %v960_v58 = vmul.f32 %v1806_v2, %v921_v54  ;;  %v856_v62 = vadd.f32 %v755_v60, %v355_v52  ;;  %v872_v63 = vadd.f32 %v819_v61, %v371_v53 }
 0x11b   : > { %1206 = vst.msk [vmem:[%s1827_s28 + $0x50] sm:$0xf] %vm1185_vm4, %v1472_v47  ;;  %v1046_v57 = vmax.f32 %v1014_v49, 0.0  ;;  %v976_v59 = vmul.f32 %v1806_v2, %v937_v55  ;;  %v757_v9 = vpop.f32.mrf.mxu0  ;;  %v821_v10 = vpop.f32.mrf.mxu1 }
 0x11c   : > { %v1457_v1 = vpack.c.bf16 %v1030_v56, %v1030_v56  ;;  %v999_v4 = vadd.f32 %v1811_v5, %v960_v58  ;;  %889 = vst.msk [vmem:[#allocation2 + $0x48] sm:$0xff] %vm313_vm0, %v856_v62  ;;  %905 = vst.msk [vmem:[#allocation2 + $0xc8] sm:$0xff] %vm313_vm0, %v872_v63 }
 0x11d   : > { %v1473_v3 = vpack.c.bf16 %v1046_v57, %v1046_v57  ;;  %v1015_v6 = vadd.f32 %v1811_v5, %v976_v59  ;;  %v922_v7 = vld [vmem:[#allocation2 + $0x38] sm:$0xff]  ;;  %v760_v16 = vpop.f32.mrf.mxu0  ;;  %v824_v17 = vpop.f32.mrf.mxu1 }
 0x11e   : > { %v938_v8 = vld [vmem:[#allocation2 + $0xb8] sm:$0xff]  ;;  %v961_v12 = vmul.f32 %v1806_v2, %v922_v7  ;;  %1191 = vst.msk [vmem:[%s1827_s28 + $0x14] sm:$0xf] %vm1185_vm4, %v1457_v1  ;;  %v1031_v14 = vmax.f32 %v999_v4, 0.0  ;;  %v857_v20 = vadd.f32 %v760_v16, %v356_v0  ;;  %v873_v21 = vadd.f32 %v824_v17, %v372_v11  ;;  %v375_v7 = vld [vmem:[#allocation2 + $0xe8] sm:$0xff] }
 0x11f   : > { %v977_v13 = vmul.f32 %v1806_v2, %v938_v8  ;;  %1207 = vst.msk [vmem:[%s1827_s28 + $0x54] sm:$0xf] %vm1185_vm4, %v1473_v3  ;;  %v1047_v15 = vmax.f32 %v1015_v6, 0.0  ;;  %v923_v24 = vld [vmem:[#allocation2 + $0x40] sm:$0xff]  ;;  %v762_v26 = vpop.f32.mrf.mxu0  ;;  %v826_v27 = vpop.f32.mrf.mxu1  ;;  %v359_v6 = vld [vmem:[#allocation2 + $0x68] sm:$0xff] }
 0x120   : > { %v1000_v18 = vadd.f32 %v1811_v5, %v961_v12  ;;  %v1458_v22 = vpack.c.bf16 %v1031_v14, %v1031_v14  ;;  %v939_v25 = vld [vmem:[#allocation2 + $0xc0] sm:$0xff]  ;;  %v962_v30 = vmul.f32 %v1806_v2, %v923_v24  ;;  %890 = vst.msk [vmem:[#allocation2 + $0x50] sm:$0xff] %vm313_vm0, %v857_v20  ;;  %906 = vst.msk [vmem:[#allocation2 + $0xd0] sm:$0xff] %vm313_vm0, %v873_v21 }
 0x121   : > { %v1016_v19 = vadd.f32 %v1811_v5, %v977_v13  ;;  %v1474_v23 = vpack.c.bf16 %v1047_v15, %v1047_v15  ;;  %v978_v31 = vmul.f32 %v1806_v2, %v939_v25  ;;  %v763_v34 = vpop.f32.mrf.mxu0  ;;  %v827_v35 = vpop.f32.mrf.mxu1 }
 0x122   : > { %v1032_v28 = vmax.f32 %v1000_v18, 0.0  ;;  %1192 = vst.msk [vmem:[%s1827_s28 + $0x18] sm:$0xf] %vm1185_vm4, %v1458_v22  ;;  %v1001_v38 = vadd.f32 %v1811_v5, %v962_v30  ;;  %v858_v42 = vadd.f32 %v763_v34, %v357_v32  ;;  %v874_v43 = vadd.f32 %v827_v35, %v373_v33  ;;  %v360_v18 = vld [vmem:[#allocation2 + $0x70] sm:$0xff] }
 0x123   : > { %v1048_v29 = vmax.f32 %v1016_v19, 0.0  ;;  %1208 = vst.msk [vmem:[%s1827_s28 + $0x58] sm:$0xf] %vm1185_vm4, %v1474_v23  ;;  %v1017_v39 = vadd.f32 %v1811_v5, %v978_v31  ;;  %v924_v40 = vld [vmem:[#allocation2 + $0x48] sm:$0xff]  ;;  %v765_v44 = vpop.f32.mrf.mxu0  ;;  %v829_v45 = vpop.f32.mrf.mxu1  ;;  %v376_v19 = vld [vmem:[#allocation2 + $0xf0] sm:$0xff] }
 0x124   : > { %v1459_v36 = vpack.c.bf16 %v1032_v28, %v1032_v28  ;;  %v940_v41 = vld [vmem:[#allocation2 + $0xc8] sm:$0xff]  ;;  %v1033_v46 = vmax.f32 %v1001_v38, 0.0  ;;  %v963_v48 = vmul.f32 %v1806_v2, %v924_v40  ;;  %891 = vst.msk [vmem:[#allocation2 + $0x58] sm:$0xff] %vm313_vm0, %v858_v42  ;;  %907 = vst.msk [vmem:[#allocation2 + $0xd8] sm:$0xff] %vm313_vm0, %v874_v43 }
 0x125   : > { %v1475_v37 = vpack.c.bf16 %v1048_v29, %v1048_v29  ;;  %v1049_v47 = vmax.f32 %v1017_v39, 0.0  ;;  %v979_v49 = vmul.f32 %v1806_v2, %v940_v41  ;;  %v768_v52 = vpop.f32.mrf.mxu0  ;;  %v832_v53 = vpop.f32.mrf.mxu1 }
 0x126   : > { %1193 = vst.msk [vmem:[%s1827_s28 + $0x1c] sm:$0xf] %vm1185_vm4, %v1459_v36  ;;  %v1460_v54 = vpack.c.bf16 %v1033_v46, %v1033_v46  ;;  %v1002_v56 = vadd.f32 %v1811_v5, %v963_v48  ;;  %v859_v60 = vadd.f32 %v768_v52, %v358_v50  ;;  %v875_v61 = vadd.f32 %v832_v53, %v374_v51  ;;  %v361_v36 = vld [vmem:[#allocation2 + $0x78] sm:$0xff] }
 0x127   : > { %1209 = vst.msk [vmem:[%s1827_s28 + $0x5c] sm:$0xf] %vm1185_vm4, %v1475_v37  ;;  %v1476_v55 = vpack.c.bf16 %v1049_v47, %v1049_v47  ;;  %v1018_v57 = vadd.f32 %v1811_v5, %v979_v49  ;;  %v925_v58 = vld [vmem:[#allocation2 + $0x50] sm:$0xff]  ;;  %v770_v62 = vpop.f32.mrf.mxu0  ;;  %v834_v63 = vpop.f32.mrf.mxu1  ;;  %v377_v37 = vld [vmem:[#allocation2 + $0xf8] sm:$0xff] }
 0x128   : > { %v941_v59 = vld [vmem:[#allocation2 + $0xd0] sm:$0xff]  ;;  %1194 = vst.msk [vmem:[%s1827_s28 + $0x20] sm:$0xf] %vm1185_vm4, %v1460_v54  ;;  %v1034_v0 = vmax.f32 %v1002_v56, 0.0  ;;  %v964_v3 = vmul.f32 %v1806_v2, %v925_v58 }
 0x129   : > { %1210 = vst.msk [vmem:[%s1827_s28 + $0x60] sm:$0xf] %vm1185_vm4, %v1476_v55  ;;  %v1050_v1 = vmax.f32 %v1018_v57, 0.0  ;;  %v980_v4 = vmul.f32 %v1806_v2, %v941_v59  ;;  %v771_v8 = vpop.f32.mrf.mxu0  ;;  %v835_v9 = vpop.f32.mrf.mxu1 }
 0x12a   : > { %892 = vst.msk [vmem:[#allocation2 + $0x60] sm:$0xff] %vm313_vm0, %v859_v60  ;;  %908 = vst.msk [vmem:[#allocation2 + $0xe0] sm:$0xff] %vm313_vm0, %v875_v61  ;;  %v1461_v10 = vpack.c.bf16 %v1034_v0, %v1034_v0  ;;  %v1003_v12 = vadd.f32 %v1811_v5, %v964_v3  ;;  %v860_v14 = vadd.f32 %v771_v8, %v359_v6 }
 0x12b   : > { %v1477_v11 = vpack.c.bf16 %v1050_v1, %v1050_v1  ;;  %v1019_v13 = vadd.f32 %v1811_v5, %v980_v4  ;;  %v876_v15 = vadd.f32 %v835_v9, %v375_v7  ;;  %v773_v16 = vpop.f32.mrf.mxu0  ;;  %v837_v17 = vpop.f32.mrf.mxu1  ;;  %v926_v22 = vld [vmem:[#allocation2 + $0x58] sm:$0xff] }
 0x12c   : > { %1195 = vst.msk [vmem:[%s1827_s28 + $0x24] sm:$0xf] %vm1185_vm4, %v1461_v10  ;;  %v1035_v20 = vmax.f32 %v1003_v12, 0.0  ;;  %v942_v23 = vld [vmem:[#allocation2 + $0xd8] sm:$0xff]  ;;  %v965_v24 = vmul.f32 %v1806_v2, %v926_v22 }
 0x12d   : > { %1211 = vst.msk [vmem:[%s1827_s28 + $0x64] sm:$0xf] %vm1185_vm4, %v1477_v11  ;;  %v1051_v21 = vmax.f32 %v1019_v13, 0.0  ;;  %v981_v25 = vmul.f32 %v1806_v2, %v942_v23  ;;  %v776_v26 = vpop.f32.mrf.mxu0  ;;  %v840_v27 = vpop.f32.mrf.mxu1 }
 0x12e   : > { %893 = vst.msk [vmem:[#allocation2 + $0x68] sm:$0xff] %vm313_vm0, %v860_v14  ;;  %909 = vst.msk [vmem:[#allocation2 + $0xe8] sm:$0xff] %vm313_vm0, %v876_v15  ;;  %v1462_v28 = vpack.c.bf16 %v1035_v20, %v1035_v20  ;;  %v861_v30 = vadd.f32 %v776_v26, %v360_v18  ;;  %v877_v31 = vadd.f32 %v840_v27, %v376_v19 }
 0x12f   : > { %v1478_v29 = vpack.c.bf16 %v1051_v21, %v1051_v21  ;;  %v1004_v32 = vadd.f32 %v1811_v5, %v965_v24  ;;  %v1020_v33 = vadd.f32 %v1811_v5, %v981_v25  ;;  %v778_v34 = vpop.f32.mrf.mxu0  ;;  %v842_v35 = vpop.f32.mrf.mxu1 }
 0x130   : > { %1196 = vst.msk [vmem:[%s1827_s28 + $0x28] sm:$0xf] %vm1185_vm4, %v1462_v28 }
 0x131   : > { %1212 = vst.msk [vmem:[%s1827_s28 + $0x68] sm:$0xf] %vm1185_vm4, %v1478_v29  ;;  %v927_v38 = vld [vmem:[#allocation2 + $0x60] sm:$0xff]  ;;  %v1036_v40 = vmax.f32 %v1004_v32, 0.0  ;;  %v1052_v41 = vmax.f32 %v1020_v33, 0.0  ;;  %v779_v44 = vpop.f32.mrf.mxu0  ;;  %v843_v45 = vpop.f32.mrf.mxu1 }
 0x132   : > { %v943_v39 = vld [vmem:[#allocation2 + $0xe0] sm:$0xff]  ;;  %894 = vst.msk [vmem:[#allocation2 + $0x70] sm:$0xff] %vm313_vm0, %v861_v30  ;;  %910 = vst.msk [vmem:[#allocation2 + $0xf0] sm:$0xff] %vm313_vm0, %v877_v31  ;;  %v966_v42 = vmul.f32 %v1806_v2, %v927_v38  ;;  %v862_v46 = vadd.f32 %v779_v44, %v361_v36  ;;  %v878_v47 = vadd.f32 %v843_v45, %v377_v37 }
 0x133   : > { %v982_v43 = vmul.f32 %v1806_v2, %v943_v39  ;;  %v1463_v48 = vpack.c.bf16 %v1036_v40, %v1036_v40  ;;  %v1479_v49 = vpack.c.bf16 %v1052_v41, %v1052_v41  ;;  %v781_v52 = vpop.f32.mrf.mxu0  ;;  %v845_v53 = vpop.f32.mrf.mxu1 }
 0x134   : > { %v1005_v50 = vadd.f32 %v1811_v5, %v966_v42  ;;  %895 = vst.msk [vmem:[#allocation2 + $0x78] sm:$0xff] %vm313_vm0, %v862_v46  ;;  %911 = vst.msk [vmem:[#allocation2 + $0xf8] sm:$0xff] %vm313_vm0, %v878_v47 }
 0x135   : > { %v1021_v51 = vadd.f32 %v1811_v5, %v982_v43  ;;  %v928_v54 = vld [vmem:[#allocation2 + $0x68] sm:$0xff]  ;;  %1197 = vst.msk [vmem:[%s1827_s28 + $0x2c] sm:$0xf] %vm1185_vm4, %v1463_v48  ;;  %1213 = vst.msk [vmem:[%s1827_s28 + $0x6c] sm:$0xf] %vm1185_vm4, %v1479_v49 }
 0x136   : > { %v944_v55 = vld [vmem:[#allocation2 + $0xe8] sm:$0xff]  ;;  %v1037_v56 = vmax.f32 %v1005_v50, 0.0  ;;  %v967_v58 = vmul.f32 %v1806_v2, %v928_v54 }
 0x137   : > { %v1053_v57 = vmax.f32 %v1021_v51, 0.0  ;;  %v983_v59 = vmul.f32 %v1806_v2, %v944_v55 }
 0x138   : > { %v1464_v60 = vpack.c.bf16 %v1037_v56, %v1037_v56  ;;  %v1006_v62 = vadd.f32 %v1811_v5, %v967_v58 }
 0x139   : > { %v1480_v61 = vpack.c.bf16 %v1053_v57, %v1053_v57  ;;  %v1022_v63 = vadd.f32 %v1811_v5, %v983_v59  ;;  %v929_v0 = vld [vmem:[#allocation2 + $0x70] sm:$0xff] }
 0x13a   : > { %v945_v1 = vld [vmem:[#allocation2 + $0xf0] sm:$0xff]  ;;  %v968_v3 = vmul.f32 %v1806_v2, %v929_v0  ;;  %1198 = vst.msk [vmem:[%s1827_s28 + $0x30] sm:$0xf] %vm1185_vm4, %v1464_v60  ;;  %v1038_v6 = vmax.f32 %v1006_v62, 0.0 }
 0x13b   : > { %v984_v4 = vmul.f32 %v1806_v2, %v945_v1  ;;  %1214 = vst.msk [vmem:[%s1827_s28 + $0x70] sm:$0xf] %vm1185_vm4, %v1480_v61  ;;  %v1054_v7 = vmax.f32 %v1022_v63, 0.0  ;;  %v930_v12 = vld [vmem:[#allocation2 + $0x78] sm:$0xff] }
 0x13c   : > { %v1007_v8 = vadd.f32 %v1811_v5, %v968_v3  ;;  %v1465_v10 = vpack.c.bf16 %v1038_v6, %v1038_v6  ;;  %v946_v13 = vld [vmem:[#allocation2 + $0xf8] sm:$0xff]  ;;  %v969_v16 = vmul.f32 %v1806_v2, %v930_v12 }
 0x13d   : > { %v1023_v9 = vadd.f32 %v1811_v5, %v984_v4  ;;  %v1481_v11 = vpack.c.bf16 %v1054_v7, %v1054_v7  ;;  %v985_v17 = vmul.f32 %v1806_v2, %v946_v13 }
 0x13e   : > { %v1039_v14 = vmax.f32 %v1007_v8, 0.0  ;;  %1199 = vst.msk [vmem:[%s1827_s28 + $0x34] sm:$0xf] %vm1185_vm4, %v1465_v10  ;;  %v1008_v20 = vadd.f32 %v1811_v5, %v969_v16 }
 0x13f   : > { %v1055_v15 = vmax.f32 %v1023_v9, 0.0  ;;  %1215 = vst.msk [vmem:[%s1827_s28 + $0x74] sm:$0xf] %vm1185_vm4, %v1481_v11  ;;  %v1024_v21 = vadd.f32 %v1811_v5, %v985_v17 }
 0x140   : > { %v1466_v18 = vpack.c.bf16 %v1039_v14, %v1039_v14  ;;  %v1040_v22 = vmax.f32 %v1008_v20, 0.0 }
 0x141   : > { %v1482_v19 = vpack.c.bf16 %v1055_v15, %v1055_v15  ;;  %v1056_v23 = vmax.f32 %v1024_v21, 0.0 }
 0x142   : > { %1200 = vst.msk [vmem:[%s1827_s28 + $0x38] sm:$0xf] %vm1185_vm4, %v1466_v18  ;;  %v1467_v24 = vpack.c.bf16 %v1040_v22, %v1040_v22 }
 0x143   : > { %1216 = vst.msk [vmem:[%s1827_s28 + $0x78] sm:$0xf] %vm1185_vm4, %v1482_v19  ;;  %v1483_v25 = vpack.c.bf16 %v1056_v23, %v1056_v23 }
 0x144   : > { %1201 = vst.msk [vmem:[%s1827_s28 + $0x3c] sm:$0xf] %vm1185_vm4, %v1467_v24 }
 0x145   : > { %1217 = vst.msk [vmem:[%s1827_s28 + $0x7c] sm:$0xf] %vm1185_vm4, %v1483_v25 }
 0x146 PF: > { %s14_s17 = sadd.s32 1, %s1611_s17   ;;  %s1989_s15 = smov %s1607_s16 }
 0x147   : > { %p11_p5 = scmp.ge.s32.totalorder %s14_s17, 4   ;;  %s1990_s16 = smov %s1992_s18 }
 0x149   :  { %13 = sbr.rel (!%p11_p5) target bundleno = 2 (0x2), region = 83 }

</bundles_post_ra>
